<compile_context>
chip_gen: v7x
topology: tpu7x:2x2x1
jax: 0.10.0
libtpu: 0.0.40
codegen_flags: <defaults>
</compile_context>

<pallas_src>
import functools

import jax
import jax.numpy as jnp
from jax.experimental import pallas as pl
from jax.experimental.pallas import tpu as pltpu


# ---------------------------------------------------------------------------
# helpers
# ---------------------------------------------------------------------------
def _round_up(x, m):
    return (x + m - 1) // m * m


def _pick_head_tiles(rows, h_pad, v128, bytes_mm, budget=20 * 1024 * 1024):
    """Row tile, vocab tile and padded dims for the output-head matmul."""
    rows8 = _round_up(rows, 8)
    tm = rows8 if rows8 <= 512 else 256          # >=256 rows -> full MXU occupancy
    rows_pad = _round_up(rows, tm)
    tn = 128
    for cand in (4096, 2048, 1024, 512, 256, 128):
        # double-buffered Y + W_out tiles (matmul dtype) + f32 out tile + bias
        fp = (2 * bytes_mm * (tm * h_pad + h_pad * cand)
              + 2 * 4 * (tm * cand + cand))
        if fp <= budget:
            tn = cand
            break
    tn = min(tn, v128)
    v_pad = _round_up(v128, tn)
    return rows_pad, tm, tn, v_pad


# ---------------------------------------------------------------------------
# kernels
# ---------------------------------------------------------------------------
def _rnn_recurrence_kernel(t_chunk, seq_len,
                           xproj_ref, h0_ref, whh_ref, y_ref, state_ref):
    """Serial recurrence over one (batch-block, time-chunk) tile.

    xproj_ref: (t_chunk, b_blk, h_pad) f32  -- W_ih^T[token] + b_ih + b_hh
    h0_ref:    (1, b_blk, h_pad)       f32  -- initial hidden state
    whh_ref:   (h_pad, h_pad)          f32/bf16 -- W_hh^T (zero-padded)
    y_ref:     (t_chunk, b_blk, h_pad) f32  -- per-step hidden outputs
    state_ref: (1, b_blk, h_pad)       f32  -- running / final state (grid-resident)
    """
    c = pl.program_id(1)                          # time-chunk index (sequential axis)

    @pl.when(c == 0)
    def _():
        state_ref[0] = h0_ref[0]

    mm_dtype = whh_ref.dtype
    base = c * t_chunk
    guard_tail = (seq_len % t_chunk) != 0         # static: only guard if padded tail

    def step(s, h):
        h_new = jnp.tanh(
            xproj_ref[s]
            + jnp.dot(h.astype(mm_dtype), whh_ref[...],
                      preferred_element_type=jnp.float32)
        )
        y_ref[s] = h_new
        if guard_tail:
            h_new = jnp.where(base + s < seq_len, h_new, h)
        return h_new

    h_last = jax.lax.fori_loop(0, t_chunk, step, state_ref[0], unroll=True)
    state_ref[0] = h_last


def _head_kernel(y_ref, w_ref, b_ref, out_ref):
    """Fully-parallel output head tile: (tm, h_pad) @ (h_pad, tn) + (1, tn)."""
    out_ref[...] = (
        jnp.dot(y_ref[...], w_ref[...], preferred_element_type=jnp.float32)
        + b_ref[...]
    )


# ---------------------------------------------------------------------------
# forward wrapper
# ---------------------------------------------------------------------------
def rnn_model_forward(inputs, state, params, vocab_size, num_hiddens,
                      use_bf16=False, max_time_chunk=128):
    """inputs: (batch, seq) int32 token ids; state: (1, batch, hidden) float32."""
    batch, seq = inputs.shape
    f32 = jnp.float32
    mm_dtype = jnp.bfloat16 if use_bf16 else f32
    bytes_mm = 2 if use_bf16 else 4

    h_pad = _round_up(num_hiddens, 128)           # lane-dense hidden dim
    b_pad = _round_up(batch, 8)                   # sublane-aligned batch
    v128 = _round_up(vocab_size, 128)

    # --- recurrence tiling ---------------------------------------------------
    if b_pad >= 16 and b_pad % 16 == 0:
        b_blk = b_pad // 2                        # 2 batch blocks -> v7x megacore
    else:
        b_blk = b_pad
    n_bblk = b_pad // b_blk

    vmem_budget = 20 * 1024 * 1024
    t_chunk = max(1, min(seq, max_time_chunk))

    def _rec_fp(tc):
        return (2 * 2 * 4 * tc * b_blk * h_pad    # x_proj + Y chunks, double-buffered
                + bytes_mm * h_pad * h_pad        # W_hh^T (resident)
                + 2 * 4 * b_blk * h_pad)          # h0 + state blocks

    while t_chunk > 8 and _rec_fp(t_chunk) > vmem_budget:
        t_chunk = max(8, t_chunk // 2)
    seq_pad = _round_up(seq, t_chunk)
    n_chunks = seq_pad // t_chunk

    # --- head tiling ----------------------------------------------------------
    rows = seq * batch
    rows_pad, tm, tn, v_pad = _pick_head_tiles(rows, h_pad, v128, bytes_mm)

    # --- pad weights with zeros (exactly preserves the unpadded math) --------
    wih_t = jnp.zeros((vocab_size, h_pad), f32).at[:, :num_hiddens].set(params["W_ih"].T)
    whh_t = (jnp.zeros((h_pad, h_pad), f32)
             .at[:num_hiddens, :num_hiddens].set(params["W_hh"].T)
             .astype(mm_dtype))
    b_hid = jnp.zeros((h_pad,), f32).at[:num_hiddens].set(params["b_ih"] + params["b_hh"])
    wout_t = (jnp.zeros((h_pad, v_pad), f32)
              .at[:num_hiddens, :vocab_size].set(params["W_out"].T)
              .astype(mm_dtype))
    b_out = jnp.zeros((1, v_pad), f32).at[0, :vocab_size].set(params["b_out"])

    # --- input projection as a gather (one-hot @ W_ih^T == row select) ------
    tokens = inputs.T                                       # (seq, batch), time-major
    xg = jnp.take(wih_t, tokens, axis=0) + b_hid            # (seq, batch, h_pad)
    x_proj = jnp.zeros((seq_pad, b_pad, h_pad), f32).at[:seq, :batch].set(xg)
    h0 = jnp.zeros((1, b_pad, h_pad), f32).at[0, :batch, :num_hiddens].set(state[0])

    # --- serial recurrence, chunked over time, batch-parallel ----------------
    y_pad, state_pad = pl.pallas_call(
        functools.partial(_rnn_recurrence_kernel, t_chunk, seq),
        out_shape=(
            jax.ShapeDtypeStruct((seq_pad, b_pad, h_pad), f32),
            jax.ShapeDtypeStruct((1, b_pad, h_pad), f32),
        ),
        grid_spec=pl.GridSpec(
            grid=(n_bblk, n_chunks),
            in_specs=[
                pl.BlockSpec((t_chunk, b_blk, h_pad), lambda b, c: (c, b, 0)),  # x_proj
                pl.BlockSpec((1, b_blk, h_pad), lambda b, c: (0, b, 0)),        # h0
                pl.BlockSpec((h_pad, h_pad), lambda b, c: (0, 0)),              # W_hh^T
            ],
            out_specs=(
                pl.BlockSpec((t_chunk, b_blk, h_pad), lambda b, c: (c, b, 0)),  # Y
                pl.BlockSpec((1, b_blk, h_pad), lambda b, c: (0, b, 0)),        # state
            ),
        ),
        compiler_params=pltpu.CompilerParams(
            dimension_semantics=("parallel", "arbitrary"),   # batch || , time serial
            vmem_limit_bytes=32 * 1024 * 1024,
        ),
    )(x_proj, h0, whh_t)

    # --- fully-parallel output head (separate MXU-tiled kernel) --------------
    y_valid = y_pad if (seq_pad, b_pad) == (seq, batch) else y_pad[:seq, :batch]
    y_flat = y_valid.reshape(rows, h_pad).astype(mm_dtype)
    if rows_pad != rows:
        y_flat = jnp.zeros((rows_pad, h_pad), mm_dtype).at[:rows].set(y_flat)

    logits_pad = pl.pallas_call(
        _head_kernel,
        out_shape=jax.ShapeDtypeStruct((rows_pad, v_pad), f32),
        grid_spec=pl.GridSpec(
            grid=(rows_pad // tm, v_pad // tn),
            in_specs=[
                pl.BlockSpec((tm, h_pad), lambda i, j: (i, 0)),   # Y rows
                pl.BlockSpec((h_pad, tn), lambda i, j: (0, j)),   # W_out^T
                pl.BlockSpec((1, tn), lambda i, j: (0, j)),       # b_out
            ],
            out_specs=pl.BlockSpec((tm, tn), lambda i, j: (i, j)),
        ),
        compiler_params=pltpu.CompilerParams(
            dimension_semantics=("parallel", "parallel"),         # shards across TCs
            vmem_limit_bytes=32 * 1024 * 1024,
        ),
    )(y_flat, wout_t, b_out)

    # Slice padding off.
    output = logits_pad[:rows, :vocab_size]                  # (seq*batch, vocab)
    new_state = state_pad[:, :batch, :num_hiddens]           # (1, batch, hidden)
    return output, new_state


# ---------------------------------------------------------------------------
# params / reference
# ---------------------------------------------------------------------------
def init_params(key, vocab_size, num_hiddens):
    """Deterministic init mirroring PyTorch nn.RNN / nn.Linear shapes."""
    k = 1.0 / jnp.sqrt(num_hiddens)
    keys = jax.random.split(key, 6)
    u = lambda kk, shape, bound: jax.random.uniform(
        kk, shape, minval=-bound, maxval=bound, dtype=jnp.float32)
    return {
        "W_ih": u(keys[0], (num_hiddens, vocab_size), k),
        "W_hh": u(keys[1], (num_hiddens, num_hiddens), k),
        "b_ih": u(keys[2], (num_hiddens,), k),
        "b_hh": u(keys[3], (num_hiddens,), k),
        "W_out": u(keys[4], (vocab_size, num_hiddens), k),
        "b_out": u(keys[5], (vocab_size,), k),
    }


def reference_forward(inputs, state, params, vocab_size):
    """Pure-JAX reference (mirrors the PyTorch forward)."""
    X = jax.nn.one_hot(inputs.T, vocab_size, dtype=jnp.float32)
    h = state[0]
    ys = []
    for t in range(X.shape[0]):
        h = jnp.tanh(X[t] @ params["W_ih"].T + params["b_ih"]
                     + h @ params["W_hh"].T + params["b_hh"])
        ys.append(h)
    Y = jnp.stack(ys, axis=0)
    out = Y.reshape(-1, Y.shape[-1]) @ params["W_out"].T + params["b_out"]
    return out, h[None]


def _check(name, inputs, state, params, vocab, hidden, use_bf16, atol, rtol, **kw):
    out, st = rnn_model_forward(inputs, state, params, vocab, hidden,
                                use_bf16=use_bf16, **kw)
    out = jax.block_until_ready(out)
    st = jax.block_until_ready(st)
    ref_out, ref_st = reference_forward(inputs, state, params, vocab)
    batch, seq = inputs.shape
    assert out.shape == (seq * batch, vocab), name
    assert st.shape == (1, batch, hidden), name
    assert jnp.allclose(out, ref_out, atol=atol, rtol=rtol), name
    assert jnp.allclose(st, ref_st, atol=atol, rtol=rtol), name


if __name__ == "__main__":
    key = jax.random.PRNGKey(0)

    # Small config (spec-consistent small shapes).
    vocab, hidden, batch, seq = 16, 32, 2, 8
    k_inp, k_par, key = jax.random.split(key, 3)
    inputs = jax.random.randint(k_inp, (batch, seq), 0, vocab, dtype=jnp.int32)
    state = jnp.zeros((1, batch, hidden), dtype=jnp.float32)   # begin_state
    params = init_params(k_par, vocab, hidden)
    _check("small_f32", inputs, state, params, vocab, hidden, False, 1e-4, 1e-4)
    _check("small_bf16", inputs, state, params, vocab, hidden, True, 5e-2, 5e-2)

    # Medium config: exercises time-chunk tail, batch-block split, row padding.
    vocab, hidden, batch, seq = 32, 64, 32, 35
    k_inp, k_par = jax.random.split(key)
    inputs = jax.random.randint(k_inp, (batch, seq), 0, vocab, dtype=jnp.int32)
    state = jnp.zeros((1, batch, hidden), dtype=jnp.float32)
    params = init_params(k_par, vocab, hidden)
    _check("med_f32", inputs, state, params, vocab, hidden, False, 5e-4, 5e-4,
           max_time_chunk=16)
    _check("med_bf16", inputs, state, params, vocab, hidden, True, 5e-2, 5e-2,
           max_time_chunk=16)

    print("KERNEL_OK")
</pallas_src>

<mosaic_0001>
module attributes {stable_mosaic.version = 11 : i64} {
  func.func @_rnn_recurrence_kernel(%arg0: i32, %arg1: i32, %arg2: memref<8x8x128xf32, #tpu.memory_space<vmem>>, %arg3: memref<1x8x128xf32, #tpu.memory_space<vmem>>, %arg4: memref<128x128xf32, #tpu.memory_space<vmem>>, %arg5: memref<8x8x128xf32, #tpu.memory_space<vmem>>, %arg6: memref<1x8x128xf32, #tpu.memory_space<vmem>>) attributes {dimension_semantics = [#tpu.dimension_semantics<parallel>, #tpu.dimension_semantics<arbitrary>], iteration_bounds = array<i64: 1, 1>, scalar_prefetch = 0 : i64, scratch_operands = 0 : i64, tpu.core_type = #tpu.core_type<tc>, window_params = [{transform_indices = @transform_0, window_bounds = array<i64: 8, 8, 128>}, {transform_indices = @transform_1, window_bounds = array<i64: 1, 8, 128>}, {pipeline_mode = #tpu.pipeline_mode<synchronous>, transform_indices = @transform_2, window_bounds = array<i64: 128, 128>}, {transform_indices = @transform_3, window_bounds = array<i64: 8, 8, 128>}, {transform_indices = @transform_4, window_bounds = array<i64: 1, 8, 128>}]} {
    %c0_i32 = arith.constant 0 : i32
    %0 = arith.cmpi eq, %arg1, %c0_i32 : i32
    %1 = arith.extui %0 : i1 to i32
    %c0_i32_0 = arith.constant 0 : i32
    %2 = arith.cmpi ne, %1, %c0_i32_0 : i32
    scf.if %2 {
      %c0_62 = arith.constant 0 : index
      %c0_63 = arith.constant 0 : index
      %c0_64 = arith.constant 0 : index
      %96 = vector.load %arg3[%c0_62, %c0_63, %c0_64] : memref<1x8x128xf32, #tpu.memory_space<vmem>>, vector<1x8x128xf32>
      %97 = vector.shape_cast %96 : vector<1x8x128xf32> to vector<8x128xf32>
      %c0_65 = arith.constant 0 : index
      %c0_66 = arith.constant 0 : index
      %c0_67 = arith.constant 0 : index
      %98 = vector.load %arg6[%c0_65, %c0_66, %c0_67] : memref<1x8x128xf32, #tpu.memory_space<vmem>>, vector<1x8x128xf32>
      %99 = vector.shape_cast %98 : vector<1x8x128xf32> to vector<8x128xf32>
      %100 = vector.shape_cast %97 : vector<8x128xf32> to vector<1x8x128xf32>
      tpu.vector_store %arg6[%c0_65, %c0_66, %c0_67], %100 {strides = array<i32>} : memref<1x8x128xf32, #tpu.memory_space<vmem>>, vector<1x8x128xf32>,
    } else {
    }
    %c0 = arith.constant 0 : index
    %c0_1 = arith.constant 0 : index
    %c0_2 = arith.constant 0 : index
    %3 = vector.load %arg6[%c0, %c0_1, %c0_2] : memref<1x8x128xf32, #tpu.memory_space<vmem>>, vector<1x8x128xf32>
    %4 = vector.shape_cast %3 : vector<1x8x128xf32> to vector<8x128xf32>
    %c0_i32_3 = arith.constant 0 : i32
    %5 = arith.index_cast %c0_i32_3 : i32 to index
    %c0_4 = arith.constant 0 : index
    %c0_5 = arith.constant 0 : index
    %6 = vector.load %arg2[%5, %c0_4, %c0_5] : memref<8x8x128xf32, #tpu.memory_space<vmem>>, vector<1x8x128xf32>
    %7 = vector.shape_cast %6 : vector<1x8x128xf32> to vector<8x128xf32>
    %c0_6 = arith.constant 0 : index
    %c0_7 = arith.constant 0 : index
    %8 = vector.load %arg4[%c0_6, %c0_7] : memref<128x128xf32, #tpu.memory_space<vmem>>, vector<128x128xf32>
    %cst = arith.constant dense<0.000000e+00> : vector<8x128xf32>
    %9 = tpu.matmul %4, %8, %cst {dimension_numbers = #tpu.dot_dimension_numbers<[1], [0], [0], [1], [0, 0, 1, 1], [], []>} : vector<8x128xf32>, vector<128x128xf32>, vector<8x128xf32> -> vector<8x128xf32>
    %10 = arith.addf %7, %9 : vector<8x128xf32>
    %11 = math.tanh %10 : vector<8x128xf32>
    %12 = arith.index_cast %c0_i32_3 : i32 to index
    %c0_8 = arith.constant 0 : index
    %c0_9 = arith.constant 0 : index
    %13 = vector.load %arg5[%12, %c0_8, %c0_9] : memref<8x8x128xf32, #tpu.memory_space<vmem>>, vector<1x8x128xf32>
    %14 = vector.shape_cast %13 : vector<1x8x128xf32> to vector<8x128xf32>
    %15 = vector.shape_cast %11 : vector<8x128xf32> to vector<1x8x128xf32>
    tpu.vector_store %arg5[%12, %c0_8, %c0_9], %15 {strides = array<i32>} : memref<8x8x128xf32, #tpu.memory_space<vmem>>, vector<1x8x128xf32>,
    %c1_i32 = arith.constant 1 : i32
    %16 = arith.index_cast %c1_i32 : i32 to index
    %c0_10 = arith.constant 0 : index
    %c0_11 = arith.constant 0 : index
    %17 = vector.load %arg2[%16, %c0_10, %c0_11] : memref<8x8x128xf32, #tpu.memory_space<vmem>>, vector<1x8x128xf32>
    %18 = vector.shape_cast %17 : vector<1x8x128xf32> to vector<8x128xf32>
    %c0_12 = arith.constant 0 : index
    %c0_13 = arith.constant 0 : index
    %19 = vector.load %arg4[%c0_12, %c0_13] : memref<128x128xf32, #tpu.memory_space<vmem>>, vector<128x128xf32>
    %cst_14 = arith.constant dense<0.000000e+00> : vector<8x128xf32>
    %20 = tpu.matmul %11, %19, %cst_14 {dimension_numbers = #tpu.dot_dimension_numbers<[1], [0], [0], [1], [0, 0, 1, 1], [], []>} : vector<8x128xf32>, vector<128x128xf32>, vector<8x128xf32> -> vector<8x128xf32>
    %21 = arith.addf %18, %20 : vector<8x128xf32>
    %22 = math.tanh %21 : vector<8x128xf32>
    %23 = arith.index_cast %c1_i32 : i32 to index
    %c0_15 = arith.constant 0 : index
    %c0_16 = arith.constant 0 : index
    %24 = vector.load %arg5[%23, %c0_15, %c0_16] : memref<8x8x128xf32, #tpu.memory_space<vmem>>, vector<1x8x128xf32>
    %25 = vector.shape_cast %24 : vector<1x8x128xf32> to vector<8x128xf32>
    %26 = vector.shape_cast %22 : vector<8x128xf32> to vector<1x8x128xf32>
    tpu.vector_store %arg5[%23, %c0_15, %c0_16], %26 {strides = array<i32>} : memref<8x8x128xf32, #tpu.memory_space<vmem>>, vector<1x8x128xf32>,
    %c2_i32 = arith.constant 2 : i32
    %27 = arith.index_cast %c2_i32 : i32 to index
    %c0_17 = arith.constant 0 : index
    %c0_18 = arith.constant 0 : index
    %28 = vector.load %arg2[%27, %c0_17, %c0_18] : memref<8x8x128xf32, #tpu.memory_space<vmem>>, vector<1x8x128xf32>
    %29 = vector.shape_cast %28 : vector<1x8x128xf32> to vector<8x128xf32>
    %c0_19 = arith.constant 0 : index
    %c0_20 = arith.constant 0 : index
    %30 = vector.load %arg4[%c0_19, %c0_20] : memref<128x128xf32, #tpu.memory_space<vmem>>, vector<128x128xf32>
    %cst_21 = arith.constant dense<0.000000e+00> : vector<8x128xf32>
    %31 = tpu.matmul %22, %30, %cst_21 {dimension_numbers = #tpu.dot_dimension_numbers<[1], [0], [0], [1], [0, 0, 1, 1], [], []>} : vector<8x128xf32>, vector<128x128xf32>, vector<8x128xf32> -> vector<8x128xf32>
    %32 = arith.addf %29, %31 : vector<8x128xf32>
    %33 = math.tanh %32 : vector<8x128xf32>
    %34 = arith.index_cast %c2_i32 : i32 to index
    %c0_22 = arith.constant 0 : index
    %c0_23 = arith.constant 0 : index
    %35 = vector.load %arg5[%34, %c0_22, %c0_23] : memref<8x8x128xf32, #tpu.memory_space<vmem>>, vector<1x8x128xf32>
    %36 = vector.shape_cast %35 : vector<1x8x128xf32> to vector<8x128xf32>
    %37 = vector.shape_cast %33 : vector<8x128xf32> to vector<1x8x128xf32>
    tpu.vector_store %arg5[%34, %c0_22, %c0_23], %37 {strides = array<i32>} : memref<8x8x128xf32, #tpu.memory_space<vmem>>, vector<1x8x128xf32>,
    %c3_i32 = arith.constant 3 : i32
    %38 = arith.index_cast %c3_i32 : i32 to index
    %c0_24 = arith.constant 0 : index
    %c0_25 = arith.constant 0 : index
    %39 = vector.load %arg2[%38, %c0_24, %c0_25] : memref<8x8x128xf32, #tpu.memory_space<vmem>>, vector<1x8x128xf32>
    %40 = vector.shape_cast %39 : vector<1x8x128xf32> to vector<8x128xf32>
    %c0_26 = arith.constant 0 : index
    %c0_27 = arith.constant 0 : index
    %41 = vector.load %arg4[%c0_26, %c0_27] : memref<128x128xf32, #tpu.memory_space<vmem>>, vector<128x128xf32>
    %cst_28 = arith.constant dense<0.000000e+00> : vector<8x128xf32>
    %42 = tpu.matmul %33, %41, %cst_28 {dimension_numbers = #tpu.dot_dimension_numbers<[1], [0], [0], [1], [0, 0, 1, 1], [], []>} : vector<8x128xf32>, vector<128x128xf32>, vector<8x128xf32> -> vector<8x128xf32>
    %43 = arith.addf %40, %42 : vector<8x128xf32>
    %44 = math.tanh %43 : vector<8x128xf32>
    %45 = arith.index_cast %c3_i32 : i32 to index
    %c0_29 = arith.constant 0 : index
    %c0_30 = arith.constant 0 : index
    %46 = vector.load %arg5[%45, %c0_29, %c0_30] : memref<8x8x128xf32, #tpu.memory_space<vmem>>, vector<1x8x128xf32>
    %47 = vector.shape_cast %46 : vector<1x8x128xf32> to vector<8x128xf32>
    %48 = vector.shape_cast %44 : vector<8x128xf32> to vector<1x8x128xf32>
    tpu.vector_store %arg5[%45, %c0_29, %c0_30], %48 {strides = array<i32>} : memref<8x8x128xf32, #tpu.memory_space<vmem>>, vector<1x8x128xf32>,
    %c4_i32 = arith.constant 4 : i32
    %49 = arith.index_cast %c4_i32 : i32 to index
    %c0_31 = arith.constant 0 : index
    %c0_32 = arith.constant 0 : index
    %50 = vector.load %arg2[%49, %c0_31, %c0_32] : memref<8x8x128xf32, #tpu.memory_space<vmem>>, vector<1x8x128xf32>
    %51 = vector.shape_cast %50 : vector<1x8x128xf32> to vector<8x128xf32>
    %c0_33 = arith.constant 0 : index
    %c0_34 = arith.constant 0 : index
    %52 = vector.load %arg4[%c0_33, %c0_34] : memref<128x128xf32, #tpu.memory_space<vmem>>, vector<128x128xf32>
    %cst_35 = arith.constant dense<0.000000e+00> : vector<8x128xf32>
    %53 = tpu.matmul %44, %52, %cst_35 {dimension_numbers = #tpu.dot_dimension_numbers<[1], [0], [0], [1], [0, 0, 1, 1], [], []>} : vector<8x128xf32>, vector<128x128xf32>, vector<8x128xf32> -> vector<8x128xf32>
    %54 = arith.addf %51, %53 : vector<8x128xf32>
    %55 = math.tanh %54 : vector<8x128xf32>
    %56 = arith.index_cast %c4_i32 : i32 to index
    %c0_36 = arith.constant 0 : index
    %c0_37 = arith.constant 0 : index
    %57 = vector.load %arg5[%56, %c0_36, %c0_37] : memref<8x8x128xf32, #tpu.memory_space<vmem>>, vector<1x8x128xf32>
    %58 = vector.shape_cast %57 : vector<1x8x128xf32> to vector<8x128xf32>
    %59 = vector.shape_cast %55 : vector<8x128xf32> to vector<1x8x128xf32>
    tpu.vector_store %arg5[%56, %c0_36, %c0_37], %59 {strides = array<i32>} : memref<8x8x128xf32, #tpu.memory_space<vmem>>, vector<1x8x128xf32>,
    %c5_i32 = arith.constant 5 : i32
    %60 = arith.index_cast %c5_i32 : i32 to index
    %c0_38 = arith.constant 0 : index
    %c0_39 = arith.constant 0 : index
    %61 = vector.load %arg2[%60, %c0_38, %c0_39] : memref<8x8x128xf32, #tpu.memory_space<vmem>>, vector<1x8x128xf32>
    %62 = vector.shape_cast %61 : vector<1x8x128xf32> to vector<8x128xf32>
    %c0_40 = arith.constant 0 : index
    %c0_41 = arith.constant 0 : index
    %63 = vector.load %arg4[%c0_40, %c0_41] : memref<128x128xf32, #tpu.memory_space<vmem>>, vector<128x128xf32>
    %cst_42 = arith.constant dense<0.000000e+00> : vector<8x128xf32>
    %64 = tpu.matmul %55, %63, %cst_42 {dimension_numbers = #tpu.dot_dimension_numbers<[1], [0], [0], [1], [0, 0, 1, 1], [], []>} : vector<8x128xf32>, vector<128x128xf32>, vector<8x128xf32> -> vector<8x128xf32>
    %65 = arith.addf %62, %64 : vector<8x128xf32>
    %66 = math.tanh %65 : vector<8x128xf32>
    %67 = arith.index_cast %c5_i32 : i32 to index
    %c0_43 = arith.constant 0 : index
    %c0_44 = arith.constant 0 : index
    %68 = vector.load %arg5[%67, %c0_43, %c0_44] : memref<8x8x128xf32, #tpu.memory_space<vmem>>, vector<1x8x128xf32>
    %69 = vector.shape_cast %68 : vector<1x8x128xf32> to vector<8x128xf32>
    %70 = vector.shape_cast %66 : vector<8x128xf32> to vector<1x8x128xf32>
    tpu.vector_store %arg5[%67, %c0_43, %c0_44], %70 {strides = array<i32>} : memref<8x8x128xf32, #tpu.memory_space<vmem>>, vector<1x8x128xf32>,
    %c6_i32 = arith.constant 6 : i32
    %71 = arith.index_cast %c6_i32 : i32 to index
    %c0_45 = arith.constant 0 : index
    %c0_46 = arith.constant 0 : index
    %72 = vector.load %arg2[%71, %c0_45, %c0_46] : memref<8x8x128xf32, #tpu.memory_space<vmem>>, vector<1x8x128xf32>
    %73 = vector.shape_cast %72 : vector<1x8x128xf32> to vector<8x128xf32>
    %c0_47 = arith.constant 0 : index
    %c0_48 = arith.constant 0 : index
    %74 = vector.load %arg4[%c0_47, %c0_48] : memref<128x128xf32, #tpu.memory_space<vmem>>, vector<128x128xf32>
    %cst_49 = arith.constant dense<0.000000e+00> : vector<8x128xf32>
    %75 = tpu.matmul %66, %74, %cst_49 {dimension_numbers = #tpu.dot_dimension_numbers<[1], [0], [0], [1], [0, 0, 1, 1], [], []>} : vector<8x128xf32>, vector<128x128xf32>, vector<8x128xf32> -> vector<8x128xf32>
    %76 = arith.addf %73, %75 : vector<8x128xf32>
    %77 = math.tanh %76 : vector<8x128xf32>
    %78 = arith.index_cast %c6_i32 : i32 to index
    %c0_50 = arith.constant 0 : index
    %c0_51 = arith.constant 0 : index
    %79 = vector.load %arg5[%78, %c0_50, %c0_51] : memref<8x8x128xf32, #tpu.memory_space<vmem>>, vector<1x8x128xf32>
    %80 = vector.shape_cast %79 : vector<1x8x128xf32> to vector<8x128xf32>
    %81 = vector.shape_cast %77 : vector<8x128xf32> to vector<1x8x128xf32>
    tpu.vector_store %arg5[%78, %c0_50, %c0_51], %81 {strides = array<i32>} : memref<8x8x128xf32, #tpu.memory_space<vmem>>, vector<1x8x128xf32>,
    %c7_i32 = arith.constant 7 : i32
    %82 = arith.index_cast %c7_i32 : i32 to index
    %c0_52 = arith.constant 0 : index
    %c0_53 = arith.constant 0 : index
    %83 = vector.load %arg2[%82, %c0_52, %c0_53] : memref<8x8x128xf32, #tpu.memory_space<vmem>>, vector<1x8x128xf32>
    %84 = vector.shape_cast %83 : vector<1x8x128xf32> to vector<8x128xf32>
    %c0_54 = arith.constant 0 : index
    %c0_55 = arith.constant 0 : index
    %85 = vector.load %arg4[%c0_54, %c0_55] : memref<128x128xf32, #tpu.memory_space<vmem>>, vector<128x128xf32>
    %cst_56 = arith.constant dense<0.000000e+00> : vector<8x128xf32>
    %86 = tpu.matmul %77, %85, %cst_56 {dimension_numbers = #tpu.dot_dimension_numbers<[1], [0], [0], [1], [0, 0, 1, 1], [], []>} : vector<8x128xf32>, vector<128x128xf32>, vector<8x128xf32> -> vector<8x128xf32>
    %87 = arith.addf %84, %86 : vector<8x128xf32>
    %88 = math.tanh %87 : vector<8x128xf32>
    %89 = arith.index_cast %c7_i32 : i32 to index
    %c0_57 = arith.constant 0 : index
    %c0_58 = arith.constant 0 : index
    %90 = vector.load %arg5[%89, %c0_57, %c0_58] : memref<8x8x128xf32, #tpu.memory_space<vmem>>, vector<1x8x128xf32>
    %91 = vector.shape_cast %90 : vector<1x8x128xf32> to vector<8x128xf32>
    %92 = vector.shape_cast %88 : vector<8x128xf32> to vector<1x8x128xf32>
    tpu.vector_store %arg5[%89, %c0_57, %c0_58], %92 {strides = array<i32>} : memref<8x8x128xf32, #tpu.memory_space<vmem>>, vector<1x8x128xf32>,
    %c8_i32 = arith.constant 8 : i32
    %c0_59 = arith.constant 0 : index
    %c0_60 = arith.constant 0 : index
    %c0_61 = arith.constant 0 : index
    %93 = vector.load %arg6[%c0_59, %c0_60, %c0_61] : memref<1x8x128xf32, #tpu.memory_space<vmem>>, vector<1x8x128xf32>
    %94 = vector.shape_cast %93 : vector<1x8x128xf32> to vector<8x128xf32>
    %95 = vector.shape_cast %88 : vector<8x128xf32> to vector<1x8x128xf32>
    tpu.vector_store %arg6[%c0_59, %c0_60, %c0_61], %95 {strides = array<i32>} : memref<1x8x128xf32, #tpu.memory_space<vmem>>, vector<1x8x128xf32>,
    return
  }
  func.func @transform_0(%arg0: i32, %arg1: i32) -> (i32, i32, i32) {
    %c0_i32 = arith.constant 0 : i32
    %c0_i32_0 = arith.constant 0 : i32
    return %arg1, %arg0, %c0_i32 : i32, i32, i32
  }
  func.func @transform_1(%arg0: i32, %arg1: i32) -> (i32, i32, i32) {
    %c0_i32 = arith.constant 0 : i32
    %c0_i32_0 = arith.constant 0 : i32
    %c0_i32_1 = arith.constant 0 : i32
    return %c0_i32, %arg0, %c0_i32_0 : i32, i32, i32
  }
  func.func @transform_2(%arg0: i32, %arg1: i32) -> (i32, i32) {
    %c0_i32 = arith.constant 0 : i32
    %c0_i32_0 = arith.constant 0 : i32
    %c0_i32_1 = arith.constant 0 : i32
    return %c0_i32, %c0_i32_0 : i32, i32
  }
  func.func @transform_3(%arg0: i32, %arg1: i32) -> (i32, i32, i32) {
    %c0_i32 = arith.constant 0 : i32
    %c0_i32_0 = arith.constant 0 : i32
    return %arg1, %arg0, %c0_i32 : i32, i32, i32
  }
  func.func @transform_4(%arg0: i32, %arg1: i32) -> (i32, i32, i32) {
    %c0_i32 = arith.constant 0 : i32
    %c0_i32_0 = arith.constant 0 : i32
    %c0_i32_1 = arith.constant 0 : i32
    return %c0_i32, %arg0, %c0_i32_0 : i32, i32, i32
  }
}

</mosaic_0001>

<bundles_post_ra>
// kernel: tpu_custom_call.1
= control target key start
LH: loop header
LB: loop body
LE: loop exit
PB: predicated region body
PF: predicated region fallthrough
CT: control target
= control target key end

     0   :  { %10 = vsyncpa [#allocation3], 0  ;;  %s1854_s0 = inlined_call_operand.hbm [shape: f32[8,8,128], index: 0, kind: input, shape index: {}]   ;;  %s1855_s1 = inlined_call_operand.hbm [shape: f32[1,8,128], index: 1, kind: input, shape index: {}]   ;;  %s1856_s2 = inlined_call_operand.hbm [shape: f32[128,128], index: 2, kind: input, shape index: {}]   ;;  %s1857_s3 = inlined_call_operand.hbm [shape: f32[8,8,128], index: 3, kind: output, shape index: {0}]   ;;  %s1858_s4 = inlined_call_operand.hbm [shape: f32[1,8,128], index: 4, kind: output, shape index: {1}]  }
   0x1   :  { %11 = vsyncpa [#allocation6], 0 }
   0x2   :  { %12 = vsyncpa [#allocation4], 0 }
   0x3   :  { %13 = vsyncpa [#allocation10], 0  ;;  %s1583_s15 = smov [#allocation5]   ;;  %s1584_s17 = smov [#allocation2]  }
   0x4   :  { %s32_s16 = sshll.u32 %s1583_s15, 4  ;;  %s19_s18 = sshll.u32 %s1584_s17, 4  ;;  %s33_s16 = int_to_ptr.vmem [resolvable:$true] %s32_s16  ;;  %s1618_s18 = int_to_ptr.vmem [resolvable:$true] %s19_s18 }
   0x5   :  { %s1465_s21 = scalar_lea.hbm %s1855_s1, 128 }
   0x6   :  { %p1466_p0 = scmp.ne.s32.totalorder %s1855_s1, %s1465_s21  ;;  %p1469_p1 = scmp.lt.u32.totalorder %s1465_s21, %s1855_s1 }
   0x8   :  { %p1471_p2 = pnand %p1469_p1, %p1466_p0 }
   0xa   :  { %1474 = shalt.err (!%p1471_p2)
}
   0xb   :  { %s1475_s26 = scalar_lea.vmem %s33_s16, 128  ;;  %p1480_p4 = scmp.lt.s32.totalorder %s33_s16, %s33_s16 }
   0xc   :  { %p1476_p3 = scmp.ne.s32.totalorder %s33_s16, %s1475_s26  ;;  %p1481_p5 = scmp.lt.s32.totalorder %s1475_s26, %s1475_s26 }
   0xe   :  { %p1482_p6 = por %p1481_p5, %p1480_p4 }
  0x10   :  { %p1483_p7 = pnand %p1482_p6, %p1476_p3 }
  0x12   :  { %1486 = shalt.err (!%p1483_p7)
}
  0x13   :  { %35 = dma.hbm_to_vmem [thread:$0]  %s1855_s1, 128, %s33_s16, [#allocation6]  }
  0x14   :  { %s1487_s5 = scalar_lea.hbm %s1854_s0, 1024 }
  0x15   :  { %p1488_p8 = scmp.ne.s32.totalorder %s1854_s0, %s1487_s5  ;;  %p1491_p9 = scmp.lt.u32.totalorder %s1487_s5, %s1854_s0 }
  0x17   :  { %p1493_p10 = pnand %p1491_p9, %p1488_p8 }
  0x19   :  { %1496 = shalt.err (!%p1493_p10)
}
  0x1a   :  { %s1497_s10 = scalar_lea.vmem %s1618_s18, 1024  ;;  %p1502_p12 = scmp.lt.s32.totalorder %s1618_s18, %s1618_s18 }
  0x1b   :  { %p1498_p11 = scmp.ne.s32.totalorder %s1618_s18, %s1497_s10  ;;  %p1503_p13 = scmp.lt.s32.totalorder %s1497_s10, %s1497_s10 }
  0x1d   :  { %p1504_p0 = por %p1503_p13, %p1502_p12 }
  0x1f   :  { %p1505_p1 = pnand %p1504_p0, %p1498_p11 }
  0x21   :  { %1508 = shalt.err (!%p1505_p1)
}
  0x22   :  { %s1585_s1 = smov 128   ;;  %s1586_s11 = smov 8  }
  0x23   :  { %25 = dma.hbm_to_vmem [thread:$0]  %s1854_s0, 1024, %s1618_s18, [#allocation3], %s1585_s1, %s1585_s1, %s1586_s11  }
  0x24   :  { %s1587_s14 = smov [#allocation7]   ;;  %s1509_s19 = scalar_lea.hbm %s1856_s2, 2048 }
  0x25   :  { %s41_s15 = sshll.u32 %s1587_s14, 4  ;;  %p1510_p2 = scmp.ne.s32.totalorder %s1856_s2, %s1509_s19  ;;  %s42_s15 = int_to_ptr.vmem [resolvable:$true] %s41_s15 }
  0x26   :  { %p1513_p3 = scmp.lt.u32.totalorder %s1509_s19, %s1856_s2 }
  0x28   :  { %p1515_p4 = pnand %p1513_p3, %p1510_p2 }
  0x2a   :  { %1518 = shalt.err (!%p1515_p4)
}
  0x2b   :  { %s1519_s24 = scalar_lea.vmem %s42_s15, 2048  ;;  %p1524_p6 = scmp.lt.s32.totalorder %s42_s15, %s42_s15 }
  0x2c   :  { %p1520_p5 = scmp.ne.s32.totalorder %s42_s15, %s1519_s24  ;;  %p1525_p7 = scmp.lt.s32.totalorder %s1519_s24, %s1519_s24 }
  0x2e   :  { %p1526_p8 = por %p1525_p7, %p1524_p6 }
  0x30   :  { %p1527_p9 = pnand %p1526_p8, %p1520_p5 }
  0x32   :  { %1530 = shalt.err (!%p1527_p9)
}
  0x33   :  { %47 = dma.hbm_to_vmem [thread:$0]  %s1856_s2, 2048, %s42_s15, [#allocation6], %s1585_s1, %s1585_s1, %s1586_s11  }
  0x34   :  { %1575 = dma.done.wait [#allocation3], 1024  }
  0x35   :  { %1576 = vsyncadd [#allocation3], 4294966272 }
  0x36   :  { %1577 = dma.done.wait [#allocation6], 2176  }
  0x37   :  { %1578 = vsyncadd [#allocation6], 4294965120  ;;  %v1588_v0 = vmov 0.0|0.0   ;;  %vm1589_vm0 = vmmov 0   ;;  %v1590_v1 = vmov 0.0   ;;  %v65_v2 = vld [vmem:[#allocation7] sm:$0xff] }
  0x38   :  { %1247 = vmatprep.subr.bf16.mxu0 %v1588_v0  ;;  %999 = vmatprep.mubr.msk.f32.mxu0 %vm1589_vm0, %v1590_v1  ;;  %v66_v3 = vld [vmem:[#allocation7 + $0x8] sm:$0xff]  ;;  %v67_v4 = vld [vmem:[#allocation7 + $0x10] sm:$0xff]  ;;  %v68_v6 = vld [vmem:[#allocation7 + $0x18] sm:$0xff]  ;;  %s1591_s2 = smov [#allocation8]   ;;  %s1592_s26 = smov [#allocation9]  }
  0x39   :  { %1271 = vmatprep.subr.bf16.mxu1 %v1588_v0  ;;  %1034 = vmatprep.mubr.msk.f32.mxu1 %vm1589_vm0, %v1590_v1  ;;  %v1673_v5 = vpack.c.bf16 %v66_v3, %v65_v2  ;;  %v1676_v7 = vpack.c.bf16 %v68_v6, %v67_v4  ;;  %v69_v8 = vld [vmem:[#allocation7 + $0x20] sm:$0xff]  ;;  %v70_v9 = vld [vmem:[#allocation7 + $0x28] sm:$0xff]  ;;  %v71_v11 = vld [vmem:[#allocation7 + $0x30] sm:$0xff]  ;;  %s804_s25 = sshll.u32 %s1591_s2, 4  ;;  %s817_s27 = sshll.u32 %s1592_s26, 4  ;;  %s805_s25 = int_to_ptr.vmem [resolvable:$true] %s804_s25  ;;  %s818_s27 = int_to_ptr.vmem [resolvable:$true] %s817_s27 }
  0x3a   :  { %v1682_v10 = vpack.c.bf16 %v70_v9, %v69_v8  ;;  %v72_v12 = vld [vmem:[#allocation7 + $0x38] sm:$0xff]  ;;  %v73_v14 = vld [vmem:[#allocation7 + $0x40] sm:$0xff]  ;;  %v74_v15 = vld [vmem:[#allocation7 + $0x48] sm:$0xff]  ;;  %s1531_s28 = scalar_lea.vmem %s805_s25, 1024  ;;  %p1536_p11 = scmp.lt.s32.totalorder %s805_s25, %s805_s25 }
  0x3b   :  { %1249 = vmatpush3.bf16.msra.mxu0 %v1673_v5  ;;  %1273 = vmatpush3.bf16.msra.mxu1 %v1673_v5  ;;  %v1688_v13 = vpack.c.bf16 %v72_v12, %v71_v11  ;;  %v1694_v16 = vpack.c.bf16 %v74_v15, %v73_v14  ;;  %v75_v17 = vld [vmem:[#allocation7 + $0x50] sm:$0xff]  ;;  %v76_v18 = vld [vmem:[#allocation7 + $0x58] sm:$0xff]  ;;  %v77_v20 = vld [vmem:[#allocation7 + $0x60] sm:$0xff]  ;;  %p1532_p10 = scmp.ne.s32.totalorder %s805_s25, %s1531_s28  ;;  %p1537_p12 = scmp.lt.s32.totalorder %s1531_s28, %s1531_s28 }
  0x3c   :  { %1250 = vmatprep.subr.bf16.mxu0 %v1588_v0  ;;  %1274 = vmatprep.subr.bf16.mxu1 %v1588_v0  ;;  %v1700_v19 = vpack.c.bf16 %v76_v18, %v75_v17  ;;  %v78_v21 = vld [vmem:[#allocation7 + $0x68] sm:$0xff]  ;;  %v79_v23 = vld [vmem:[#allocation7 + $0x70] sm:$0xff]  ;;  %v80_v24 = vld [vmem:[#allocation7 + $0x78] sm:$0xff] }
  0x3d   :  { %v1706_v22 = vpack.c.bf16 %v78_v21, %v77_v20  ;;  %v1712_v25 = vpack.c.bf16 %v80_v24, %v79_v23  ;;  %v61_v26 = vld [vmem:[#allocation5] sm:$0xff]  ;;  %v155_v32 = vld [vmem:[#allocation2 + $0x8] sm:$0xff]  ;;  %v247_v37 = vld [vmem:[#allocation2 + $0x10] sm:$0xff]  ;;  %p1538_p13 = por %p1537_p12, %p1536_p11 }
  0x3e   :  { %v64_v27 = vld [vmem:[#allocation2] sm:$0xff]  ;;  %v339_v42 = vld [vmem:[#allocation2 + $0x18] sm:$0xff]  ;;  %v523_v52 = vld [vmem:[#allocation2 + $0x28] sm:$0xff] }
  0x3f   :  { %1252 = vmatpush3.bf16.msra.mxu0 %v1676_v7  ;;  %1276 = vmatpush3.bf16.msra.mxu1 %v1676_v7  ;;  %v431_v47 = vld [vmem:[#allocation2 + $0x20] sm:$0xff]  ;;  %v615_v57 = vld [vmem:[#allocation2 + $0x30] sm:$0xff]  ;;  %v707_v62 = vld [vmem:[#allocation2 + $0x38] sm:$0xff]  ;;  %p1539_p0 = pnand %p1538_p13, %p1532_p10 }
  0x40   :  { %1253 = vmatprep.subr.bf16.mxu0 %v1588_v0  ;;  %1277 = vmatprep.subr.bf16.mxu1 %v1588_v0 }
  0x43   :  { %1255 = vmatpush3.bf16.msra.mxu0 %v1682_v10  ;;  %1279 = vmatpush3.bf16.msra.mxu1 %v1682_v10 }
  0x44   :  { %1256 = vmatprep.subr.bf16.mxu0 %v1588_v0  ;;  %1280 = vmatprep.subr.bf16.mxu1 %v1588_v0 }
  0x47   :  { %1258 = vmatpush3.bf16.msra.mxu0 %v1688_v13  ;;  %1282 = vmatpush3.bf16.msra.mxu1 %v1688_v13 }
  0x48   :  { %1259 = vmatprep.subr.bf16.mxu0 %v1588_v0  ;;  %1283 = vmatprep.subr.bf16.mxu1 %v1588_v0 }
  0x4b   :  { %1261 = vmatpush3.bf16.msra.mxu0 %v1694_v16  ;;  %1285 = vmatpush3.bf16.msra.mxu1 %v1694_v16 }
  0x4c   :  { %1262 = vmatprep.subr.bf16.mxu0 %v1588_v0  ;;  %1286 = vmatprep.subr.bf16.mxu1 %v1588_v0 }
  0x4f   :  { %1264 = vmatpush3.bf16.msra.mxu0 %v1700_v19  ;;  %1288 = vmatpush3.bf16.msra.mxu1 %v1700_v19 }
  0x50   :  { %1265 = vmatprep.subr.bf16.mxu0 %v1588_v0  ;;  %1289 = vmatprep.subr.bf16.mxu1 %v1588_v0 }
  0x53   :  { %1267 = vmatpush3.bf16.msra.mxu0 %v1706_v22  ;;  %1291 = vmatpush3.bf16.msra.mxu1 %v1706_v22 }
  0x54   :  { %1268 = vmatprep.subr.bf16.mxu0 %v1588_v0  ;;  %1292 = vmatprep.subr.bf16.mxu1 %v1588_v0 }
  0x57   :  { %1270 = vmatpush3.bf16.msra.mxu0 %v1712_v25  ;;  %1294 = vmatpush3.bf16.msra.mxu1 %v1712_v25 }
  0x58   :  { %1295 = vmatprep.subr.bf16.mxu0 %v1588_v0  ;;  %1319 = vmatprep.subr.bf16.mxu1 %v1588_v0 }
  0x5a   :  { %1000 = vmatmul.mubr.f32.vlgmr.msra.gmra.mrb[0].mxu0 %v61_v26 }
  0x5b   :  { %1297 = vmatpush3.bf16.msra.mxu0 %v1673_v5  ;;  %1069 = vmatprep.mubr.msk.f32.mxu0 %vm1589_vm0, %v1590_v1 }
  0x5c   :  { %1298 = vmatprep.subr.bf16.mxu0 %v1588_v0 }
  0x5f   :  { %1300 = vmatpush3.bf16.msra.mxu0 %v1676_v7 }
  0x60   :  { %1301 = vmatprep.subr.bf16.mxu0 %v1588_v0 }
  0x63   :  { %1303 = vmatpush3.bf16.msra.mxu0 %v1682_v10 }
  0x64   :  { %1304 = vmatprep.subr.bf16.mxu0 %v1588_v0 }
  0x67   :  { %1306 = vmatpush3.bf16.msra.mxu0 %v1688_v13 }
  0x68   :  { %1307 = vmatprep.subr.bf16.mxu0 %v1588_v0 }
  0x6b   :  { %1309 = vmatpush3.bf16.msra.mxu0 %v1694_v16 }
  0x6c   :  { %1310 = vmatprep.subr.bf16.mxu0 %v1588_v0 }
  0x6f   :  { %1312 = vmatpush3.bf16.msra.mxu0 %v1700_v19 }
  0x70   :  { %1313 = vmatprep.subr.bf16.mxu0 %v1588_v0 }
  0x73   :  { %1315 = vmatpush3.bf16.msra.mxu0 %v1706_v22 }
  0x74   :  { %1316 = vmatprep.subr.bf16.mxu0 %v1588_v0 }
  0x77   :  { %1318 = vmatpush3.bf16.msra.mxu0 %v1712_v25 }
  0x78   :  { %1343 = vmatprep.subr.bf16.mxu0 %v1588_v0 }
 0x12d   :  { %v147_v28 = vpop.f32.mrb[0].mxu0 }
 0x12e   :  { %v151_v29 = vadd.f32 %v147_v28, %v64_v27  ;;  %v1001_v30 = vpop.f32.mrb[1].mxu0 }
 0x130   :  { %1449 = vtanh.f32 %v151_v29 }
 0x13a   :  { %v1450_v31 = vpop.eup %1449 }
 0x13b   :  { %153 = vst [vmem:[#allocation8] sm:$0xff] %v1450_v31  ;;  %1035 = vmatmul.mubr.f32.vlgmr.msra.gmra.mrb[0].mxu1 %v1450_v31 }
 0x13c   :  { %1321 = vmatpush3.bf16.msra.mxu1 %v1673_v5  ;;  %1104 = vmatprep.mubr.msk.f32.mxu1 %vm1589_vm0, %v1590_v1 }
 0x13d   :  { %1322 = vmatprep.subr.bf16.mxu1 %v1588_v0 }
 0x140   :  { %1324 = vmatpush3.bf16.msra.mxu1 %v1676_v7 }
 0x141   :  { %1325 = vmatprep.subr.bf16.mxu1 %v1588_v0 }
 0x144   :  { %1327 = vmatpush3.bf16.msra.mxu1 %v1682_v10 }
 0x145   :  { %1328 = vmatprep.subr.bf16.mxu1 %v1588_v0 }
 0x148   :  { %1330 = vmatpush3.bf16.msra.mxu1 %v1688_v13 }
 0x149   :  { %1331 = vmatprep.subr.bf16.mxu1 %v1588_v0 }
 0x14c   :  { %1333 = vmatpush3.bf16.msra.mxu1 %v1694_v16 }
 0x14d   :  { %1334 = vmatprep.subr.bf16.mxu1 %v1588_v0 }
 0x150   :  { %1336 = vmatpush3.bf16.msra.mxu1 %v1700_v19 }
 0x151   :  { %1337 = vmatprep.subr.bf16.mxu1 %v1588_v0 }
 0x154   :  { %1339 = vmatpush3.bf16.msra.mxu1 %v1706_v22 }
 0x155   :  { %1340 = vmatprep.subr.bf16.mxu1 %v1588_v0 }
 0x158   :  { %1342 = vmatpush3.bf16.msra.mxu1 %v1712_v25 }
 0x159   :  { %1367 = vmatprep.subr.bf16.mxu1 %v1588_v0 }
 0x20e   :  { %v238_v33 = vpop.f32.mrb[0].mxu1 }
 0x20f   :  { %v242_v34 = vadd.f32 %v238_v33, %v155_v32  ;;  %v1036_v35 = vpop.f32.mrb[1].mxu1 }
 0x211   :  { %1451 = vtanh.f32 %v242_v34 }
 0x21b   :  { %v1452_v36 = vpop.eup %1451 }
 0x21c   :  { %245 = vst [vmem:[#allocation8 + $0x8] sm:$0xff] %v1452_v36  ;;  %1070 = vmatmul.mubr.f32.vlgmr.msra.gmra.mrb[2].mxu0 %v1452_v36 }
 0x21d   :  { %1345 = vmatpush3.bf16.msra.mxu0 %v1673_v5  ;;  %1139 = vmatprep.mubr.msk.f32.mxu0 %vm1589_vm0, %v1590_v1 }
 0x21e   :  { %1346 = vmatprep.subr.bf16.mxu0 %v1588_v0 }
 0x221   :  { %1348 = vmatpush3.bf16.msra.mxu0 %v1676_v7 }
 0x222   :  { %1349 = vmatprep.subr.bf16.mxu0 %v1588_v0 }
 0x225   :  { %1351 = vmatpush3.bf16.msra.mxu0 %v1682_v10 }
 0x226   :  { %1352 = vmatprep.subr.bf16.mxu0 %v1588_v0 }
 0x229   :  { %1354 = vmatpush3.bf16.msra.mxu0 %v1688_v13 }
 0x22a   :  { %1355 = vmatprep.subr.bf16.mxu0 %v1588_v0 }
 0x22d   :  { %1357 = vmatpush3.bf16.msra.mxu0 %v1694_v16 }
 0x22e   :  { %1358 = vmatprep.subr.bf16.mxu0 %v1588_v0 }
 0x231   :  { %1360 = vmatpush3.bf16.msra.mxu0 %v1700_v19 }
 0x232   :  { %1361 = vmatprep.subr.bf16.mxu0 %v1588_v0 }
 0x235   :  { %1363 = vmatpush3.bf16.msra.mxu0 %v1706_v22 }
 0x236   :  { %1364 = vmatprep.subr.bf16.mxu0 %v1588_v0 }
 0x239   :  { %1366 = vmatpush3.bf16.msra.mxu0 %v1712_v25 }
 0x23a   :  { %1391 = vmatprep.subr.bf16.mxu0 %v1588_v0 }
 0x2ef   :  { %v330_v38 = vpop.f32.mrb[2].mxu0 }
 0x2f0   :  { %v334_v39 = vadd.f32 %v330_v38, %v247_v37  ;;  %v1071_v40 = vpop.f32.mrb[3].mxu0 }
 0x2f2   :  { %1453 = vtanh.f32 %v334_v39 }
 0x2fc   :  { %v1454_v41 = vpop.eup %1453 }
 0x2fd   :  { %337 = vst [vmem:[#allocation8 + $0x10] sm:$0xff] %v1454_v41  ;;  %1105 = vmatmul.mubr.f32.vlgmr.msra.gmra.mrb[2].mxu1 %v1454_v41 }
 0x2fe   :  { %1369 = vmatpush3.bf16.msra.mxu1 %v1673_v5  ;;  %1174 = vmatprep.mubr.msk.f32.mxu1 %vm1589_vm0, %v1590_v1 }
 0x2ff   :  { %1370 = vmatprep.subr.bf16.mxu1 %v1588_v0 }
 0x302   :  { %1372 = vmatpush3.bf16.msra.mxu1 %v1676_v7 }
 0x303   :  { %1373 = vmatprep.subr.bf16.mxu1 %v1588_v0 }
 0x306   :  { %1375 = vmatpush3.bf16.msra.mxu1 %v1682_v10 }
 0x307   :  { %1376 = vmatprep.subr.bf16.mxu1 %v1588_v0 }
 0x30a   :  { %1378 = vmatpush3.bf16.msra.mxu1 %v1688_v13 }
 0x30b   :  { %1379 = vmatprep.subr.bf16.mxu1 %v1588_v0 }
 0x30e   :  { %1381 = vmatpush3.bf16.msra.mxu1 %v1694_v16 }
 0x30f   :  { %1382 = vmatprep.subr.bf16.mxu1 %v1588_v0 }
 0x312   :  { %1384 = vmatpush3.bf16.msra.mxu1 %v1700_v19 }
 0x313   :  { %1385 = vmatprep.subr.bf16.mxu1 %v1588_v0 }
 0x316   :  { %1387 = vmatpush3.bf16.msra.mxu1 %v1706_v22 }
 0x317   :  { %1388 = vmatprep.subr.bf16.mxu1 %v1588_v0 }
 0x31a   :  { %1390 = vmatpush3.bf16.msra.mxu1 %v1712_v25 }
 0x31b   :  { %1415 = vmatprep.subr.bf16.mxu1 %v1588_v0 }
 0x3d0   :  { %v422_v43 = vpop.f32.mrb[2].mxu1 }
 0x3d1   :  { %v426_v44 = vadd.f32 %v422_v43, %v339_v42  ;;  %v1106_v45 = vpop.f32.mrb[3].mxu1 }
 0x3d3   :  { %1455 = vtanh.f32 %v426_v44 }
 0x3dd   :  { %v1456_v46 = vpop.eup %1455 }
 0x3de   :  { %429 = vst [vmem:[#allocation8 + $0x18] sm:$0xff] %v1456_v46  ;;  %1140 = vmatmul.mubr.f32.vlgmr.msra.gmra.mrb[4].mxu0 %v1456_v46 }
 0x3df   :  { %1393 = vmatpush3.bf16.msra.mxu0 %v1673_v5  ;;  %1209 = vmatprep.mubr.msk.f32.mxu0 %vm1589_vm0, %v1590_v1 }
 0x3e0   :  { %1394 = vmatprep.subr.bf16.mxu0 %v1588_v0 }
 0x3e3   :  { %1396 = vmatpush3.bf16.msra.mxu0 %v1676_v7 }
 0x3e4   :  { %1397 = vmatprep.subr.bf16.mxu0 %v1588_v0 }
 0x3e7   :  { %1399 = vmatpush3.bf16.msra.mxu0 %v1682_v10 }
 0x3e8   :  { %1400 = vmatprep.subr.bf16.mxu0 %v1588_v0 }
 0x3eb   :  { %1402 = vmatpush3.bf16.msra.mxu0 %v1688_v13 }
 0x3ec   :  { %1403 = vmatprep.subr.bf16.mxu0 %v1588_v0 }
 0x3ef   :  { %1405 = vmatpush3.bf16.msra.mxu0 %v1694_v16 }
 0x3f0   :  { %1406 = vmatprep.subr.bf16.mxu0 %v1588_v0 }
 0x3f3   :  { %1408 = vmatpush3.bf16.msra.mxu0 %v1700_v19 }
 0x3f4   :  { %1409 = vmatprep.subr.bf16.mxu0 %v1588_v0 }
 0x3f7   :  { %1411 = vmatpush3.bf16.msra.mxu0 %v1706_v22 }
 0x3f8   :  { %1412 = vmatprep.subr.bf16.mxu0 %v1588_v0 }
 0x3fb   :  { %1414 = vmatpush3.bf16.msra.mxu0 %v1712_v25 }
 0x4b1   :  { %v514_v48 = vpop.f32.mrb[4].mxu0 }
 0x4b2   :  { %v518_v49 = vadd.f32 %v514_v48, %v431_v47  ;;  %v1141_v50 = vpop.f32.mrb[5].mxu0 }
 0x4b4   :  { %1457 = vtanh.f32 %v518_v49 }
 0x4be   :  { %v1458_v51 = vpop.eup %1457 }
 0x4bf   :  { %521 = vst [vmem:[#allocation8 + $0x20] sm:$0xff] %v1458_v51  ;;  %1175 = vmatmul.mubr.f32.vlgmr.msra.gmra.mrb[4].mxu1 %v1458_v51 }
 0x4c0   :  { %1417 = vmatpush3.bf16.msra.mxu1 %v1673_v5  ;;  %1244 = vmatprep.mubr.msk.f32.mxu1 %vm1589_vm0, %v1590_v1 }
 0x4c1   :  { %1418 = vmatprep.subr.bf16.mxu1 %v1588_v0 }
 0x4c4   :  { %1420 = vmatpush3.bf16.msra.mxu1 %v1676_v7 }
 0x4c5   :  { %1421 = vmatprep.subr.bf16.mxu1 %v1588_v0 }
 0x4c8   :  { %1423 = vmatpush3.bf16.msra.mxu1 %v1682_v10 }
 0x4c9   :  { %1424 = vmatprep.subr.bf16.mxu1 %v1588_v0 }
 0x4cc   :  { %1426 = vmatpush3.bf16.msra.mxu1 %v1688_v13 }
 0x4cd   :  { %1427 = vmatprep.subr.bf16.mxu1 %v1588_v0 }
 0x4d0   :  { %1429 = vmatpush3.bf16.msra.mxu1 %v1694_v16 }
 0x4d1   :  { %1430 = vmatprep.subr.bf16.mxu1 %v1588_v0 }
 0x4d4   :  { %1432 = vmatpush3.bf16.msra.mxu1 %v1700_v19 }
 0x4d5   :  { %1433 = vmatprep.subr.bf16.mxu1 %v1588_v0 }
 0x4d8   :  { %1435 = vmatpush3.bf16.msra.mxu1 %v1706_v22 }
 0x4d9   :  { %1436 = vmatprep.subr.bf16.mxu1 %v1588_v0 }
 0x4dc   :  { %1438 = vmatpush3.bf16.msra.mxu1 %v1712_v25 }
 0x592   :  { %v606_v53 = vpop.f32.mrb[4].mxu1 }
 0x593   :  { %v610_v54 = vadd.f32 %v606_v53, %v523_v52  ;;  %v1176_v55 = vpop.f32.mrb[5].mxu1 }
 0x595   :  { %1459 = vtanh.f32 %v610_v54 }
 0x59f   :  { %v1460_v56 = vpop.eup %1459 }
 0x5a0   :  { %613 = vst [vmem:[#allocation8 + $0x28] sm:$0xff] %v1460_v56  ;;  %1210 = vmatmul.mubr.f32.vlgmr.msra.gmra.mrb[6].mxu0 %v1460_v56 }
 0x673   :  { %v698_v58 = vpop.f32.mrb[6].mxu0 }
 0x674   :  { %v702_v59 = vadd.f32 %v698_v58, %v615_v57  ;;  %v1211_v60 = vpop.f32.mrb[7].mxu0 }
 0x676   :  { %1461 = vtanh.f32 %v702_v59 }
 0x680   :  { %v1462_v61 = vpop.eup %1461 }
 0x681   :  { %705 = vst [vmem:[#allocation8 + $0x30] sm:$0xff] %v1462_v61  ;;  %1245 = vmatmul.mubr.f32.vlgmr.msra.gmra.mrb[6].mxu1 %v1462_v61 }
 0x754   :  { %v790_v63 = vpop.f32.mrb[6].mxu1 }
 0x755   :  { %v794_v0 = vadd.f32 %v790_v63, %v707_v62  ;;  %v1246_v1 = vpop.f32.mrb[7].mxu1 }
 0x757   :  { %1463 = vtanh.f32 %v794_v0 }
 0x761   :  { %v1464_v2 = vpop.eup %1463 }
 0x762   :  { %797 = vst [vmem:[#allocation8 + $0x38] sm:$0xff] %v1464_v2  ;;  %798 = vst [vmem:[#allocation9] sm:$0xff] %v1464_v2 }
 0x763   :  { %1542 = shalt.err (!%p1539_p0)
}
 0x764   :  { %s1543_s5 = scalar_lea.hbm %s1857_s3, 1024 }
 0x765   :  { %p1544_p1 = scmp.ne.s32.totalorder %s1857_s3, %s1543_s5  ;;  %p1547_p2 = scmp.lt.u32.totalorder %s1543_s5, %s1857_s3 }
 0x767   :  { %p1549_p3 = pnand %p1547_p2, %p1544_p1 }
 0x769   :  { %1552 = shalt.err (!%p1549_p3)
}
 0x76a   :  { %810 = dma.vmem_to_hbm [thread:$0]  %s805_s25, 1024, %s1857_s3, [#allocation4], %s1585_s1, %s1585_s1, %s1586_s11  }
 0x76b   :  { %s1553_s13 = scalar_lea.vmem %s818_s27, 128  ;;  %p1558_p5 = scmp.lt.s32.totalorder %s818_s27, %s818_s27 }
 0x76c   :  { %p1554_p4 = scmp.ne.s32.totalorder %s818_s27, %s1553_s13  ;;  %p1559_p6 = scmp.lt.s32.totalorder %s1553_s13, %s1553_s13 }
 0x76e   :  { %p1560_p7 = por %p1559_p6, %p1558_p5 }
 0x770   :  { %p1561_p8 = pnand %p1560_p7, %p1554_p4 }
 0x772   :  { %1564 = shalt.err (!%p1561_p8)
}
 0x773   :  { %s1565_s16 = scalar_lea.hbm %s1858_s4, 128 }
 0x774   :  { %p1566_p9 = scmp.ne.s32.totalorder %s1858_s4, %s1565_s16  ;;  %p1569_p10 = scmp.lt.u32.totalorder %s1565_s16, %s1858_s4 }
 0x776   :  { %p1571_p11 = pnand %p1569_p10, %p1566_p9 }
 0x778   :  { %1574 = shalt.err (!%p1571_p11)
}
 0x779   :  { %820 = dma.vmem_to_hbm [thread:$0]  %s818_s27, 128, %s1858_s4, [#allocation10]  }
 0x77a   :  { %1579 = dma.done.wait [#allocation4], 1024  }
 0x77b   :  { %1580 = vsyncadd [#allocation4], 4294966272 }
 0x77c   :  { %1581 = dma.done.wait [#allocation10], 128  }
 0x77d   :  { %1582 = vsyncadd [#allocation10], 4294967168 }
 0x77e   :  { %827 = vsyncpa [#allocation3], 1 }
 0x77f   :  { %828 = vsyncpa [#allocation6], 1 }
 0x780   :  { %829 = vsyncpa [#allocation4], 1 }
 0x781   :  { %830 = vsyncpa [#allocation10], 1 }

</bundles_post_ra>
